<compile_context>
chip_gen: v7x
topology: tpu7x:2x2x1
jax: 0.10.0
libtpu: 0.0.40
codegen_flags: <defaults>
</compile_context>

<pallas_src>
import functools

import jax
import jax.numpy as jnp
from jax.experimental import pallas as pl
from jax.experimental.pallas import tpu as pltpu


def _round_up(x, m):
    return ((x + m - 1) // m) * m


# ----------------------------- Pallas kernel --------------------------------
def dcnv2_kernel(embed_ref,             # (Bt, D)
                 VG_ref,                # (L, D, E*R + E + H1)  [V_all|gate|w1@L0]
                 C_ref,                 # (L, E*R, E*R)          block-diag C_e^T
                 UT_ref,                # (L, E*R, D)            stacked U_e^T
                 expand_ref,            # (E, E*R)               0/1 prob expander
                 bias_ref,              # (L, D)
                 b1_ref,                # (1, H1)                BN folded
                 w2_ref, b2_ref,        # (H1, H2), (1, H2)      BN folded
                 lr_w_ref, lr_b_ref,    # (D+H2, 1), (1, 1)
                 out_ref,               # (Bt, 1)
                 *, n_layers, n_experts, low_rank):
    w_dtype = VG_ref.dtype
    x0 = embed_ref[...]                                  # (Bt, D) f32
    D = x0.shape[1]
    ER = n_experts * low_rank
    G = ER + n_experts                                   # end of gate lanes

    # ------------------- CrossNetMix (experts packed on lanes) -------------------
    x_l = x0
    h = None
    for i in range(n_layers):
        # One wide MXU pass: all expert V-projections, the gate logits, and (on
        # layer 0, where x_l == x0) the first MLP hidden layer.
        vg = jnp.dot(x_l.astype(w_dtype), VG_ref[i],
                     preferred_element_type=jnp.float32)   # (Bt, ER+E+H1)
        v_x = jnp.tanh(vg[:, :ER])                          # (Bt, E*R)
        gates = vg[:, ER:G]                                 # (Bt, E)
        if i == 0:
            # MLP layer-1 peeled out of the layer-0 VG matmul (exact: x_l == x0).
            h = jnp.maximum(vg[:, G:] + b1_ref[...], 0.0)   # (Bt, H1)

        # softmax over experts; reciprocal on the (otherwise idle) EUP slot
        gates = gates - jnp.max(gates, axis=1, keepdims=True)
        eg = jnp.exp(gates)
        probs = eg * pl.reciprocal(jnp.sum(eg, axis=1, keepdims=True),
                                   approx=True)             # (Bt, E)
        # expand (Bt, E) -> (Bt, E*R): lane block e carries probs[:, e]
        p_wide = jnp.dot(probs, expand_ref[...],
                         preferred_element_type=jnp.float32)

        # block-diagonal C (pre-transposed): per-expert v_x_e @ C_e^T, one matmul
        v_x = jnp.tanh(jnp.dot(v_x.astype(w_dtype), C_ref[i],
                               preferred_element_type=jnp.float32))
        # gate probs applied BEFORE the U projection so the expert mixture
        # (sum_e p_e * uv_e) falls out of a single wide matmul.
        v_x = v_x * p_wide
        uv = jnp.dot(v_x.astype(w_dtype), UT_ref[i],
                     preferred_element_type=jnp.float32)     # (Bt, D)

        # sum_e p_e = 1  =>  moe = x0 * (sum_e p_e uv_e + bias_i)
        x_l = x0 * (uv + bias_ref[i:i + 1, :]) + x_l
    cross_out = x_l                                          # (Bt, D)

    # ------------- parallel MLP tail (layer-1 already computed above) -----------
    h = jnp.dot(h.astype(w_dtype), w2_ref[...],
                preferred_element_type=jnp.float32) + b2_ref[...]
    h = jnp.maximum(h, 0.0)                                  # (Bt, H2)

    # ------------- LR head on concat([cross, dnn]) (split weights) --------------
    logits = (jnp.dot(cross_out.astype(w_dtype), lr_w_ref[0:D, :],
                      preferred_element_type=jnp.float32)
              + jnp.dot(h.astype(w_dtype), lr_w_ref[D:, :],
                        preferred_element_type=jnp.float32)
              + lr_b_ref[...])                               # (Bt, 1)
    out_ref[...] = jax.nn.sigmoid(logits)


# ------------------------- host-side parameter packing ------------------------
def pack_params(params, *, n_layers, n_experts, low_rank, dims, eps=1e-5,
                weight_dtype=jnp.bfloat16):
    """Repack raw DCNv2 params into the kernel's fused layout.

    weight_dtype=bfloat16 (default) halves MXU operand cost on all generations;
    pass float32 when bit-level parity with an f32 reference is required.
    """
    L, E, D, R = n_layers, n_experts, dims, low_rank
    U = params["U"]            # (L, E, D, R)
    V = params["V"]            # (L, E, D, R)
    C = params["C"]            # (L, E, R, R)
    gate_w = params["gate_w"]  # (D, E)   shared across layers

    # fold eval-mode BatchNorm into the Linear weights (exact in eval mode)
    def fold_bn(w, b, g, be, m, v):
        s = g / jnp.sqrt(v + eps)
        return w * s[None, :], ((b - m) * s + be)[None, :]

    w1f, b1f = fold_bn(params["w1"], params["b1"], params["bn1_g"],
                       params["bn1_b"], params["bn1_m"], params["bn1_v"])
    w2f, b2f = fold_bn(params["w2"], params["b2"], params["bn2_g"],
                       params["bn2_b"], params["bn2_m"], params["bn2_v"])
    H1 = w1f.shape[1]

    # [V_all | gate_w | w1(layer0 only)] : (L, D, E*R + E + H1)
    V_all = jnp.transpose(V, (0, 2, 1, 3)).reshape(L, D, E * R)
    gate_b = jnp.broadcast_to(gate_w[None], (L, D, E))
    w1_slab = jnp.zeros((L, D, H1), jnp.float32).at[0].set(w1f)
    VG = jnp.concatenate([V_all, gate_b, w1_slab], axis=2)

    # strictly block-diagonal C (transposed blocks): (L, E*R, E*R)
    C_blk = jnp.zeros((L, E * R, E * R), jnp.float32)
    for e in range(E):
        C_blk = C_blk.at[:, e * R:(e + 1) * R, e * R:(e + 1) * R].set(
            jnp.transpose(C[:, e], (0, 2, 1)))

    # stacked U^T : (L, E*R, D)
    UT = jnp.transpose(U, (0, 1, 3, 2)).reshape(L, E * R, D)

    # probability expander: (E, E*R), expander[e, e*R:(e+1)*R] = 1
    expander = jnp.zeros((E, E * R), jnp.float32)
    for e in range(E):
        expander = expander.at[e, e * R:(e + 1) * R].set(1.0)

    wd = weight_dtype
    return {
        "VG": VG.astype(wd),
        "C_blk": C_blk.astype(wd),
        "UT": UT.astype(wd),
        "expander": expander.astype(jnp.float32),
        "bias": params["cross_bias"].astype(jnp.float32),
        "b1": b1f.astype(jnp.float32),
        "w2": w2f.astype(wd), "b2": b2f.astype(jnp.float32),
        "lr_w": params["lr_w"].astype(wd),
        "lr_b": params["lr_b"].reshape(1, 1).astype(jnp.float32),
    }


# ------------------------------- pallas wrapper --------------------------------
def dcnv2_forward(embed_x, packed, *, n_layers, n_experts, low_rank,
                  block_b=512):
    """block_b: batch tile; sweep 256/512/1024 — larger tiles amortize the
    ~0.35 us per-grid-step overhead (weights are VMEM-resident either way)."""
    assert n_layers >= 1
    B, D = embed_x.shape
    # Prefer the largest tile <= block_b that still yields >=2 grid tiles for
    # moderately large B, so the batch axis can shard across both TensorCores
    # on v7x under dimension_semantics=("parallel",).
    half = _round_up(pl.cdiv(B, 2), 8)
    bb = min(block_b, max(8, half))
    grid_b = pl.cdiv(B, bb)
    B_pad = grid_b * bb
    if B_pad != B:
        # Padded rows run through the kernel on zeros and are sliced off below.
        embed_x = jnp.pad(embed_x, ((0, B_pad - B), (0, 0)))

    param_list = [packed["VG"], packed["C_blk"], packed["UT"],
                  packed["expander"], packed["bias"], packed["b1"],
                  packed["w2"], packed["b2"], packed["lr_w"], packed["lr_b"]]

    def const_spec(a):
        # full-array block, constant index map -> weights stay VMEM-resident
        return pl.BlockSpec(a.shape, lambda i, _nd=a.ndim: (0,) * _nd)

    kernel = functools.partial(dcnv2_kernel, n_layers=n_layers,
                               n_experts=n_experts, low_rank=low_rank)
    out = pl.pallas_call(
        kernel,
        out_shape=jax.ShapeDtypeStruct((B_pad, 1), jnp.float32),
        grid=(grid_b,),
        in_specs=([pl.BlockSpec((bb, D), lambda i: (i, 0))]
                  + [const_spec(a) for a in param_list]),
        out_specs=pl.BlockSpec((bb, 1), lambda i: (i, 0)),
        compiler_params=pltpu.CompilerParams(
            dimension_semantics=("parallel",)),
    )(embed_x, *param_list)
    return out[:B, 0]                      # matches torch `.squeeze(1)` -> (B,)


# ------------------------- pure-JAX reference (unfused) ------------------------
def dcnv2_reference(embed_x, params, *, n_layers, n_experts, low_rank):
    x0 = embed_x
    x_l = x0
    for i in range(n_layers):
        gates = x_l @ params["gate_w"]
        probs = jax.nn.softmax(gates, axis=1)
        moe = jnp.zeros_like(x_l)
        for e in range(n_experts):
            Vm = params["V"][i, e]
            Cm = params["C"][i, e]
            Um = params["U"][i, e]
            v_x = jnp.tanh(x_l @ Vm)
            v_x = jnp.tanh(v_x @ Cm.T)
            uv = v_x @ Um.T
            dot_ = x0 * (uv + params["cross_bias"][i][None, :])
            moe = moe + dot_ * probs[:, e:e + 1]
        x_l = moe + x_l
    cross_out = x_l

    eps = 1e-5
    h = x0 @ params["w1"] + params["b1"]
    h = (h - params["bn1_m"]) / jnp.sqrt(params["bn1_v"] + eps) \
        * params["bn1_g"] + params["bn1_b"]
    h = jnp.maximum(h, 0.0)
    h = h @ params["w2"] + params["b2"]
    h = (h - params["bn2_m"]) / jnp.sqrt(params["bn2_v"] + eps) \
        * params["bn2_g"] + params["bn2_b"]
    h = jnp.maximum(h, 0.0)

    final = jnp.concatenate([cross_out, h], axis=1)
    logits = final @ params["lr_w"] + params["lr_b"]
    return jax.nn.sigmoid(logits)[:, 0]


# ----------------------------------- main --------------------------------------
if __name__ == "__main__":
    # Model hyper-params (small, consistent with DCNv2.__init__)
    n_features = 4
    embed_dim = 16
    vocab_sizes = [11, 23, 37, 53]
    D = n_features * embed_dim            # self.dims = 64
    n_cross_layers = 2
    low_rank = 32
    num_experts = 4
    mlp_dims = [64, 32]                   # mlp_params["dims"]
    H1, H2 = mlp_dims
    final_dim = D + H2                    # parallel: dims + mlp_dims[-1]

    key = jax.random.PRNGKey(0)
    ks = list(jax.random.split(key, 40))

    def nrm(k, shape, scale=0.05):
        return (scale * jax.random.normal(k, shape)).astype(jnp.float32)

    # Embedding tables (EmbeddingLayer glue, deterministic init)
    # TODO(synk): the embedding gather itself stays in plain JAX (data-dependent
    # gather; not worth a manual DMA kernel at these sizes).
    tables = [nrm(ks[i], (vocab_sizes[i], embed_dim), 0.1)
              for i in range(n_features)]

    params = {
        # CrossNetMix
        "U": nrm(ks[4], (n_cross_layers, num_experts, D, low_rank)),
        "V": nrm(ks[5], (n_cross_layers, num_experts, D, low_rank)),
        "C": nrm(ks[6], (n_cross_layers, num_experts, low_rank, low_rank)),
        "gate_w": nrm(ks[7], (D, num_experts)),      # Linear(D,1,no bias) x E
        "cross_bias": nrm(ks[8], (n_cross_layers, D)),
        # parallel MLP (Linear + BatchNorm1d(eval) + ReLU) x 2, output_layer=False
        "w1": nrm(ks[9], (D, H1)), "b1": nrm(ks[10], (H1,)),
        "bn1_g": 1.0 + nrm(ks[11], (H1,)), "bn1_b": nrm(ks[12], (H1,)),
        "bn1_m": nrm(ks[13], (H1,)),
        "bn1_v": 1.0 + 0.5 * jax.random.uniform(ks[14], (H1,)).astype(jnp.float32),
        "w2": nrm(ks[15], (H1, H2)), "b2": nrm(ks[16], (H2,)),
        "bn2_g": 1.0 + nrm(ks[17], (H2,)), "bn2_b": nrm(ks[18], (H2,)),
        "bn2_m": nrm(ks[19], (H2,)),
        "bn2_v": 1.0 + 0.5 * jax.random.uniform(ks[20], (H2,)).astype(jnp.float32),
        # LR head
        "lr_w": nrm(ks[21], (final_dim, 1)),
        "lr_b": nrm(ks[22], (1,)),
    }

    def make_embed(batch, key_off):
        x_ids = jnp.stack(
            [jax.random.randint(ks[key_off + f], (batch,), 0, vocab_sizes[f])
             for f in range(n_features)], axis=1)
        return jnp.concatenate(
            [tables[f][x_ids[:, f]] for f in range(n_features)],
            axis=1).astype(jnp.float32)      # == EmbeddingLayer(..., squeeze_dim=True)

    hp = dict(n_layers=n_cross_layers, n_experts=num_experts, low_rank=low_rank)

    # --- f32 parity path: strict check against the unfused reference -----------
    B_small = 8
    embed_small = make_embed(B_small, 23)
    packed_f32 = pack_params(params, dims=D, weight_dtype=jnp.float32, **hp)
    y = jax.block_until_ready(dcnv2_forward(embed_small, packed_f32, **hp))
    y_ref = dcnv2_reference(embed_small, params, **hp)
    assert y.shape == (B_small,)
    assert jnp.allclose(y, y_ref, rtol=1e-4, atol=1e-4), (y, y_ref)

    # --- bf16 deployment path: multi-tile grid + padded batch, looser tol ------
    B_big = 300                              # -> 2 grid tiles, 4 padded rows
    embed_big = make_embed(B_big, 28)
    packed_bf16 = pack_params(params, dims=D, weight_dtype=jnp.bfloat16, **hp)
    y2 = jax.block_until_ready(dcnv2_forward(embed_big, packed_bf16, **hp))
    y2_ref = dcnv2_reference(embed_big, params, **hp)
    assert y2.shape == (B_big,)
    assert jnp.allclose(y2, y2_ref, rtol=2e-2, atol=2e-2), (y2, y2_ref)

    print("KERNEL_OK")
</pallas_src>

<mosaic_0001>
module attributes {stable_mosaic.version = 11 : i64} {
  func.func @dcnv2_kernel(%arg0: i32, %arg1: memref<8x64xf32, #tpu.memory_space<vmem>>, %arg2: memref<2x64x196xf32, #tpu.memory_space<vmem>>, %arg3: memref<2x128x128xf32, #tpu.memory_space<vmem>>, %arg4: memref<2x128x64xf32, #tpu.memory_space<vmem>>, %arg5: memref<4x128xf32, #tpu.memory_space<vmem>>, %arg6: memref<2x64xf32, #tpu.memory_space<vmem>>, %arg7: memref<1x64xf32, #tpu.memory_space<vmem>>, %arg8: memref<64x32xf32, #tpu.memory_space<vmem>>, %arg9: memref<1x32xf32, #tpu.memory_space<vmem>>, %arg10: memref<96x1xf32, #tpu.memory_space<vmem>>, %arg11: memref<1x1xf32, #tpu.memory_space<vmem>>, %arg12: memref<8x1xf32, #tpu.memory_space<vmem>>) attributes {dimension_semantics = [#tpu.dimension_semantics<parallel>], iteration_bounds = array<i64: 1>, scalar_prefetch = 0 : i64, scratch_operands = 0 : i64, tpu.core_type = #tpu.core_type<tc>, window_params = [{transform_indices = @transform_0, window_bounds = array<i64: 8, 64>}, {pipeline_mode = #tpu.pipeline_mode<synchronous>, transform_indices = @transform_1, window_bounds = array<i64: 2, 64, 196>}, {pipeline_mode = #tpu.pipeline_mode<synchronous>, transform_indices = @transform_2, window_bounds = array<i64: 2, 128, 128>}, {pipeline_mode = #tpu.pipeline_mode<synchronous>, transform_indices = @transform_3, window_bounds = array<i64: 2, 128, 64>}, {pipeline_mode = #tpu.pipeline_mode<synchronous>, transform_indices = @transform_4, window_bounds = array<i64: 4, 128>}, {pipeline_mode = #tpu.pipeline_mode<synchronous>, transform_indices = @transform_5, window_bounds = array<i64: 2, 64>}, {pipeline_mode = #tpu.pipeline_mode<synchronous>, transform_indices = @transform_6, window_bounds = array<i64: 1, 64>}, {pipeline_mode = #tpu.pipeline_mode<synchronous>, transform_indices = @transform_7, window_bounds = array<i64: 64, 32>}, {pipeline_mode = #tpu.pipeline_mode<synchronous>, transform_indices = @transform_8, window_bounds = array<i64: 1, 32>}, {pipeline_mode = #tpu.pipeline_mode<synchronous>, transform_indices = @transform_9, window_bounds = array<i64: 96, 1>}, {pipeline_mode = #tpu.pipeline_mode<synchronous>, transform_indices = @transform_10, window_bounds = array<i64: 1, 1>}, {transform_indices = @transform_11, window_bounds = array<i64: 8, 1>}]} {
    %c0 = arith.constant 0 : index
    %c0_0 = arith.constant 0 : index
    %0 = vector.load %arg1[%c0, %c0_0] : memref<8x64xf32, #tpu.memory_space<vmem>>, vector<8x64xf32>
    %c0_1 = arith.constant 0 : index
    %c0_2 = arith.constant 0 : index
    %c0_3 = arith.constant 0 : index
    %1 = vector.load %arg2[%c0_1, %c0_2, %c0_3] : memref<2x64x196xf32, #tpu.memory_space<vmem>>, vector<1x64x196xf32>
    %2 = vector.shape_cast %1 : vector<1x64x196xf32> to vector<64x196xf32>
    %cst = arith.constant dense<0.000000e+00> : vector<8x196xf32>
    %3 = tpu.matmul %0, %2, %cst {dimension_numbers = #tpu.dot_dimension_numbers<[1], [0], [0], [1], [0, 0, 1, 1], [], []>} : vector<8x64xf32>, vector<64x196xf32>, vector<8x196xf32> -> vector<8x196xf32>
    %4 = vector.extract_strided_slice %3 {offsets = [0, 0], sizes = [8, 128], strides = [1, 1]} : vector<8x196xf32> to vector<8x128xf32>
    %5 = math.tanh %4 : vector<8x128xf32>
    %6 = vector.extract_strided_slice %3 {offsets = [0, 128], sizes = [8, 4], strides = [1, 1]} : vector<8x196xf32> to vector<8x4xf32>
    %7 = vector.extract_strided_slice %3 {offsets = [0, 132], sizes = [8, 64], strides = [1, 1]} : vector<8x196xf32> to vector<8x64xf32>
    %c0_4 = arith.constant 0 : index
    %c0_5 = arith.constant 0 : index
    %8 = vector.load %arg7[%c0_4, %c0_5] : memref<1x64xf32, #tpu.memory_space<vmem>>, vector<1x64xf32>
    %9 = vector.broadcast %8 : vector<1x64xf32> to vector<8x64xf32>
    %10 = arith.addf %7, %9 : vector<8x64xf32>
    %cst_6 = arith.constant 0.000000e+00 : f32
    %11 = vector.broadcast %cst_6 : f32 to vector<8x64xf32>
    %12 = arith.maximumf %10, %11 : vector<8x64xf32>
    %cst_7 = arith.constant dense<0xFF800000> : vector<8xf32>
    %13 = vector.multi_reduction <maximumf>, %6, %cst_7 [1] : vector<8x4xf32> to vector<8xf32>
    %14 = vector.shape_cast %13 : vector<8xf32> to vector<8x1xf32>
    %15 = vector.broadcast %14 : vector<8x1xf32> to vector<8x4xf32>
    %16 = arith.subf %6, %15 : vector<8x4xf32>
    %17 = math.exp %16 : vector<8x4xf32>
    %cst_8 = arith.constant dense<0.000000e+00> : vector<8xf32>
    %18 = vector.multi_reduction <add>, %17, %cst_8 [1] : vector<8x4xf32> to vector<8xf32>
    %19 = vector.shape_cast %18 : vector<8xf32> to vector<8x1xf32>
    %20 = tpu.reciprocal %19 {approx = true} : vector<8x1xf32> -> vector<8x1xf32>
    %21 = vector.broadcast %20 : vector<8x1xf32> to vector<8x4xf32>
    %22 = arith.mulf %17, %21 : vector<8x4xf32>
    %c0_9 = arith.constant 0 : index
    %c0_10 = arith.constant 0 : index
    %23 = vector.load %arg5[%c0_9, %c0_10] : memref<4x128xf32, #tpu.memory_space<vmem>>, vector<4x128xf32>
    %cst_11 = arith.constant dense<0.000000e+00> : vector<8x128xf32>
    %24 = tpu.matmul %22, %23, %cst_11 {dimension_numbers = #tpu.dot_dimension_numbers<[1], [0], [0], [1], [0, 0, 1, 1], [], []>} : vector<8x4xf32>, vector<4x128xf32>, vector<8x128xf32> -> vector<8x128xf32>
    %c0_12 = arith.constant 0 : index
    %c0_13 = arith.constant 0 : index
    %c0_14 = arith.constant 0 : index
    %25 = vector.load %arg3[%c0_12, %c0_13, %c0_14] : memref<2x128x128xf32, #tpu.memory_space<vmem>>, vector<1x128x128xf32>
    %26 = vector.shape_cast %25 : vector<1x128x128xf32> to vector<128x128xf32>
    %cst_15 = arith.constant dense<0.000000e+00> : vector<8x128xf32>
    %27 = tpu.matmul %5, %26, %cst_15 {dimension_numbers = #tpu.dot_dimension_numbers<[1], [0], [0], [1], [0, 0, 1, 1], [], []>} : vector<8x128xf32>, vector<128x128xf32>, vector<8x128xf32> -> vector<8x128xf32>
    %28 = math.tanh %27 : vector<8x128xf32>
    %29 = arith.mulf %28, %24 : vector<8x128xf32>
    %c0_16 = arith.constant 0 : index
    %c0_17 = arith.constant 0 : index
    %c0_18 = arith.constant 0 : index
    %30 = vector.load %arg4[%c0_16, %c0_17, %c0_18] : memref<2x128x64xf32, #tpu.memory_space<vmem>>, vector<1x128x64xf32>
    %31 = vector.shape_cast %30 : vector<1x128x64xf32> to vector<128x64xf32>
    %cst_19 = arith.constant dense<0.000000e+00> : vector<8x64xf32>
    %32 = tpu.matmul %29, %31, %cst_19 {dimension_numbers = #tpu.dot_dimension_numbers<[1], [0], [0], [1], [0, 0, 1, 1], [], []>} : vector<8x128xf32>, vector<128x64xf32>, vector<8x64xf32> -> vector<8x64xf32>
    %c0_20 = arith.constant 0 : index
    %c0_21 = arith.constant 0 : index
    %33 = vector.load %arg6[%c0_20, %c0_21] : memref<2x64xf32, #tpu.memory_space<vmem>>, vector<1x64xf32>
    %34 = vector.broadcast %33 : vector<1x64xf32> to vector<8x64xf32>
    %35 = arith.addf %32, %34 : vector<8x64xf32>
    %36 = arith.mulf %0, %35 : vector<8x64xf32>
    %37 = arith.addf %36, %0 : vector<8x64xf32>
    %c1 = arith.constant 1 : index
    %c0_22 = arith.constant 0 : index
    %c0_23 = arith.constant 0 : index
    %38 = vector.load %arg2[%c1, %c0_22, %c0_23] : memref<2x64x196xf32, #tpu.memory_space<vmem>>, vector<1x64x196xf32>
    %39 = vector.shape_cast %38 : vector<1x64x196xf32> to vector<64x196xf32>
    %cst_24 = arith.constant dense<0.000000e+00> : vector<8x196xf32>
    %40 = tpu.matmul %37, %39, %cst_24 {dimension_numbers = #tpu.dot_dimension_numbers<[1], [0], [0], [1], [0, 0, 1, 1], [], []>} : vector<8x64xf32>, vector<64x196xf32>, vector<8x196xf32> -> vector<8x196xf32>
    %41 = vector.extract_strided_slice %40 {offsets = [0, 0], sizes = [8, 128], strides = [1, 1]} : vector<8x196xf32> to vector<8x128xf32>
    %42 = math.tanh %41 : vector<8x128xf32>
    %43 = vector.extract_strided_slice %40 {offsets = [0, 128], sizes = [8, 4], strides = [1, 1]} : vector<8x196xf32> to vector<8x4xf32>
    %cst_25 = arith.constant dense<0xFF800000> : vector<8xf32>
    %44 = vector.multi_reduction <maximumf>, %43, %cst_25 [1] : vector<8x4xf32> to vector<8xf32>
    %45 = vector.shape_cast %44 : vector<8xf32> to vector<8x1xf32>
    %46 = vector.broadcast %45 : vector<8x1xf32> to vector<8x4xf32>
    %47 = arith.subf %43, %46 : vector<8x4xf32>
    %48 = math.exp %47 : vector<8x4xf32>
    %cst_26 = arith.constant dense<0.000000e+00> : vector<8xf32>
    %49 = vector.multi_reduction <add>, %48, %cst_26 [1] : vector<8x4xf32> to vector<8xf32>
    %50 = vector.shape_cast %49 : vector<8xf32> to vector<8x1xf32>
    %51 = tpu.reciprocal %50 {approx = true} : vector<8x1xf32> -> vector<8x1xf32>
    %52 = vector.broadcast %51 : vector<8x1xf32> to vector<8x4xf32>
    %53 = arith.mulf %48, %52 : vector<8x4xf32>
    %c0_27 = arith.constant 0 : index
    %c0_28 = arith.constant 0 : index
    %54 = vector.load %arg5[%c0_27, %c0_28] : memref<4x128xf32, #tpu.memory_space<vmem>>, vector<4x128xf32>
    %cst_29 = arith.constant dense<0.000000e+00> : vector<8x128xf32>
    %55 = tpu.matmul %53, %54, %cst_29 {dimension_numbers = #tpu.dot_dimension_numbers<[1], [0], [0], [1], [0, 0, 1, 1], [], []>} : vector<8x4xf32>, vector<4x128xf32>, vector<8x128xf32> -> vector<8x128xf32>
    %c1_30 = arith.constant 1 : index
    %c0_31 = arith.constant 0 : index
    %c0_32 = arith.constant 0 : index
    %56 = vector.load %arg3[%c1_30, %c0_31, %c0_32] : memref<2x128x128xf32, #tpu.memory_space<vmem>>, vector<1x128x128xf32>
    %57 = vector.shape_cast %56 : vector<1x128x128xf32> to vector<128x128xf32>
    %cst_33 = arith.constant dense<0.000000e+00> : vector<8x128xf32>
    %58 = tpu.matmul %42, %57, %cst_33 {dimension_numbers = #tpu.dot_dimension_numbers<[1], [0], [0], [1], [0, 0, 1, 1], [], []>} : vector<8x128xf32>, vector<128x128xf32>, vector<8x128xf32> -> vector<8x128xf32>
    %59 = math.tanh %58 : vector<8x128xf32>
    %60 = arith.mulf %59, %55 : vector<8x128xf32>
    %c1_34 = arith.constant 1 : index
    %c0_35 = arith.constant 0 : index
    %c0_36 = arith.constant 0 : index
    %61 = vector.load %arg4[%c1_34, %c0_35, %c0_36] : memref<2x128x64xf32, #tpu.memory_space<vmem>>, vector<1x128x64xf32>
    %62 = vector.shape_cast %61 : vector<1x128x64xf32> to vector<128x64xf32>
    %cst_37 = arith.constant dense<0.000000e+00> : vector<8x64xf32>
    %63 = tpu.matmul %60, %62, %cst_37 {dimension_numbers = #tpu.dot_dimension_numbers<[1], [0], [0], [1], [0, 0, 1, 1], [], []>} : vector<8x128xf32>, vector<128x64xf32>, vector<8x64xf32> -> vector<8x64xf32>
    %c1_38 = arith.constant 1 : index
    %c0_39 = arith.constant 0 : index
    %64 = vector.load %arg6[%c1_38, %c0_39] : memref<2x64xf32, #tpu.memory_space<vmem>>, vector<1x64xf32>
    %65 = vector.broadcast %64 : vector<1x64xf32> to vector<8x64xf32>
    %66 = arith.addf %63, %65 : vector<8x64xf32>
    %67 = arith.mulf %0, %66 : vector<8x64xf32>
    %68 = arith.addf %67, %37 : vector<8x64xf32>
    %c0_40 = arith.constant 0 : index
    %c0_41 = arith.constant 0 : index
    %69 = vector.load %arg8[%c0_40, %c0_41] : memref<64x32xf32, #tpu.memory_space<vmem>>, vector<64x32xf32>
    %cst_42 = arith.constant dense<0.000000e+00> : vector<8x32xf32>
    %70 = tpu.matmul %12, %69, %cst_42 {dimension_numbers = #tpu.dot_dimension_numbers<[1], [0], [0], [1], [0, 0, 1, 1], [], []>} : vector<8x64xf32>, vector<64x32xf32>, vector<8x32xf32> -> vector<8x32xf32>
    %c0_43 = arith.constant 0 : index
    %c0_44 = arith.constant 0 : index
    %71 = vector.load %arg9[%c0_43, %c0_44] : memref<1x32xf32, #tpu.memory_space<vmem>>, vector<1x32xf32>
    %72 = vector.broadcast %71 : vector<1x32xf32> to vector<8x32xf32>
    %73 = arith.addf %70, %72 : vector<8x32xf32>
    %cst_45 = arith.constant 0.000000e+00 : f32
    %74 = vector.broadcast %cst_45 : f32 to vector<8x32xf32>
    %75 = arith.maximumf %73, %74 : vector<8x32xf32>
    %c0_46 = arith.constant 0 : index
    %c0_47 = arith.constant 0 : index
    %76 = vector.load %arg10[%c0_46, %c0_47] : memref<96x1xf32, #tpu.memory_space<vmem>>, vector<64x1xf32>
    %cst_48 = arith.constant dense<0.000000e+00> : vector<8x1xf32>
    %77 = tpu.matmul %68, %76, %cst_48 {dimension_numbers = #tpu.dot_dimension_numbers<[1], [0], [0], [1], [0, 0, 1, 1], [], []>} : vector<8x64xf32>, vector<64x1xf32>, vector<8x1xf32> -> vector<8x1xf32>
    %c64 = arith.constant 64 : index
    %c0_49 = arith.constant 0 : index
    %78 = vector.load %arg10[%c64, %c0_49] : memref<96x1xf32, #tpu.memory_space<vmem>>, vector<32x1xf32>
    %cst_50 = arith.constant dense<0.000000e+00> : vector<8x1xf32>
    %79 = tpu.matmul %75, %78, %cst_50 {dimension_numbers = #tpu.dot_dimension_numbers<[1], [0], [0], [1], [0, 0, 1, 1], [], []>} : vector<8x32xf32>, vector<32x1xf32>, vector<8x1xf32> -> vector<8x1xf32>
    %80 = arith.addf %77, %79 : vector<8x1xf32>
    %c0_51 = arith.constant 0 : index
    %c0_52 = arith.constant 0 : index
    %81 = vector.load %arg11[%c0_51, %c0_52] : memref<1x1xf32, #tpu.memory_space<vmem>>, vector<1x1xf32>
    %82 = vector.broadcast %81 : vector<1x1xf32> to vector<8x1xf32>
    %83 = arith.addf %80, %82 : vector<8x1xf32>
    %84 = arith.negf %83 : vector<8x1xf32>
    %85 = math.exp %84 : vector<8x1xf32>
    %cst_53 = arith.constant 1.000000e+00 : f32
    %86 = vector.broadcast %cst_53 : f32 to vector<8x1xf32>
    %87 = arith.addf %86, %85 : vector<8x1xf32>
    %88 = arith.divf %86, %87 : vector<8x1xf32>
    %c0_54 = arith.constant 0 : index
    %c0_55 = arith.constant 0 : index
    %89 = vector.load %arg12[%c0_54, %c0_55] : memref<8x1xf32, #tpu.memory_space<vmem>>, vector<8x1xf32>
    tpu.vector_store %arg12[%c0_54, %c0_55], %88 {strides = array<i32>} : memref<8x1xf32, #tpu.memory_space<vmem>>, vector<8x1xf32>,
    return
  }
  func.func @transform_0(%arg0: i32) -> (i32, i32) {
    %c0_i32 = arith.constant 0 : i32
    %c0_i32_0 = arith.constant 0 : i32
    return %arg0, %c0_i32 : i32, i32
  }
  func.func @transform_1(%arg0: i32) -> (i32, i32, i32) {
    %c0_i32 = arith.constant 0 : i32
    %c0_i32_0 = arith.constant 0 : i32
    %c0_i32_1 = arith.constant 0 : i32
    %c0_i32_2 = arith.constant 0 : i32
    return %c0_i32, %c0_i32_0, %c0_i32_1 : i32, i32, i32
  }
  func.func @transform_2(%arg0: i32) -> (i32, i32, i32) {
    %c0_i32 = arith.constant 0 : i32
    %c0_i32_0 = arith.constant 0 : i32
    %c0_i32_1 = arith.constant 0 : i32
    %c0_i32_2 = arith.constant 0 : i32
    return %c0_i32, %c0_i32_0, %c0_i32_1 : i32, i32, i32
  }
  func.func @transform_3(%arg0: i32) -> (i32, i32, i32) {
    %c0_i32 = arith.constant 0 : i32
    %c0_i32_0 = arith.constant 0 : i32
    %c0_i32_1 = arith.constant 0 : i32
    %c0_i32_2 = arith.constant 0 : i32
    return %c0_i32, %c0_i32_0, %c0_i32_1 : i32, i32, i32
  }
  func.func @transform_4(%arg0: i32) -> (i32, i32) {
    %c0_i32 = arith.constant 0 : i32
    %c0_i32_0 = arith.constant 0 : i32
    %c0_i32_1 = arith.constant 0 : i32
    return %c0_i32, %c0_i32_0 : i32, i32
  }
  func.func @transform_5(%arg0: i32) -> (i32, i32) {
    %c0_i32 = arith.constant 0 : i32
    %c0_i32_0 = arith.constant 0 : i32
    %c0_i32_1 = arith.constant 0 : i32
    return %c0_i32, %c0_i32_0 : i32, i32
  }
  func.func @transform_6(%arg0: i32) -> (i32, i32) {
    %c0_i32 = arith.constant 0 : i32
    %c0_i32_0 = arith.constant 0 : i32
    %c0_i32_1 = arith.constant 0 : i32
    return %c0_i32, %c0_i32_0 : i32, i32
  }
  func.func @transform_7(%arg0: i32) -> (i32, i32) {
    %c0_i32 = arith.constant 0 : i32
    %c0_i32_0 = arith.constant 0 : i32
    %c0_i32_1 = arith.constant 0 : i32
    return %c0_i32, %c0_i32_0 : i32, i32
  }
  func.func @transform_8(%arg0: i32) -> (i32, i32) {
    %c0_i32 = arith.constant 0 : i32
    %c0_i32_0 = arith.constant 0 : i32
    %c0_i32_1 = arith.constant 0 : i32
    return %c0_i32, %c0_i32_0 : i32, i32
  }
  func.func @transform_9(%arg0: i32) -> (i32, i32) {
    %c0_i32 = arith.constant 0 : i32
    %c0_i32_0 = arith.constant 0 : i32
    %c0_i32_1 = arith.constant 0 : i32
    return %c0_i32, %c0_i32_0 : i32, i32
  }
  func.func @transform_10(%arg0: i32) -> (i32, i32) {
    %c0_i32 = arith.constant 0 : i32
    %c0_i32_0 = arith.constant 0 : i32
    %c0_i32_1 = arith.constant 0 : i32
    return %c0_i32, %c0_i32_0 : i32, i32
  }
  func.func @transform_11(%arg0: i32) -> (i32, i32) {
    %c0_i32 = arith.constant 0 : i32
    %c0_i32_0 = arith.constant 0 : i32
    return %arg0, %c0_i32 : i32, i32
  }
}

</mosaic_0001>

<bundles_post_ra>
// kernel: tpu_custom_call.1
= control target key start
LH: loop header
LB: loop body
LE: loop exit
PB: predicated region body
PF: predicated region fallthrough
CT: control target
= control target key end

     0   :  { %v1584_v3 = vmov 0.0   ;;  %vm57_vm0 = vcmask 523264   ;;  %vm144_vm1 = vcmask 31744   ;;  %vm160_vm2 = vcmask 1043456   ;;  %s1587_s16 = smov 4   ;;  %s2116_s1 = inlined_call_operand.vmem [shape: f32[2,64,196], index: 1, kind: input, shape index: {}]   ;;  %s2117_s0 = inlined_call_operand.vmem [shape: f32[8,64], index: 0, kind: input, shape index: {}]   ;;  %s2118_s6 = inlined_call_operand.vmem [shape: f32[1,64], index: 6, kind: input, shape index: {}]   ;;  %s2119_s4 = inlined_call_operand.vmem [shape: f32[4,128], index: 4, kind: input, shape index: {}]   ;;  %s2120_s2 = inlined_call_operand.vmem [shape: f32[2,128,128], index: 2, kind: input, shape index: {}]   ;;  %s2121_s3 = inlined_call_operand.vmem [shape: f32[2,128,64], index: 3, kind: input, shape index: {}]   ;;  %s2122_s5 = inlined_call_operand.vmem [shape: f32[2,64], index: 5, kind: input, shape index: {}]   ;;  %s2123_s7 = inlined_call_operand.vmem [shape: f32[64,32], index: 7, kind: input, shape index: {}]   ;;  %s2124_s9 = inlined_call_operand.vmem [shape: f32[96,1], index: 9, kind: input, shape index: {}]   ;;  %s2125_s8 = inlined_call_operand.vmem [shape: f32[1,32], index: 8, kind: input, shape index: {}]   ;;  %s2126_s10 = inlined_call_operand.<no memory space> [shape: f32[1,1], index: 10, kind: input, shape index: {}]   ;;  %s2127_s11 = inlined_call_operand.vmem [shape: f32[8,1], index: 11, kind: output, shape index: {}]  }
   0x1   :  { %v42_v0 = vld [vmem:[%s2116_s1 + $0x8] sm:$0xff]  ;;  %v44_v1 = vld [vmem:[%s2116_s1 + $0x18] sm:$0xff]  ;;  %v41_v2 = vld [vmem:[%s2116_s1] sm:$0xff]  ;;  %125 = vmatprep.mubr.f32.mxu0 %v1584_v3  ;;  %1202 = vmatprep.subr.mxu1 %v1584_v3  ;;  %vm1585_vm3 = vmmov 0   ;;  %v1586_v36 = vmov 0.0|0.0   ;;  %vm877_vm4 = vcmask 261120  }
   0x2   :  { %v1401_v4 = vpack.c.bf16 %v44_v1, %v42_v0  ;;  %v43_v5 = vld [vmem:[%s2116_s1 + $0x10] sm:$0xff]  ;;  %v46_v6 = vld [vmem:[%s2116_s1 + $0x28] sm:$0xff]  ;;  %v48_v7 = vld [vmem:[%s2116_s1 + $0x38] sm:$0xff]  ;;  %1204 = vmatprep.mubr.msk.f32.mxu1 %vm1585_vm3, %v1584_v3  ;;  %vm1038_vm5 = vcmask 7168  }
   0x3   :  { %v1403_v8 = vpack.c.bf16 %v43_v5, %v41_v2  ;;  %v1405_v9 = vpack.c.bf16 %v48_v7, %v46_v6  ;;  %v45_v10 = vld [vmem:[%s2116_s1 + $0x20] sm:$0xff]  ;;  %v47_v11 = vld [vmem:[%s2116_s1 + $0x30] sm:$0xff]  ;;  %v50_v12 = vld [vmem:[%s2116_s1 + $0x48] sm:$0xff] }
   0x4   :  { %1402 = vmatprep.subr.bf16.mxu0 %v1401_v4  ;;  %v52_v13 = vld [vmem:[%s2116_s1 + $0x58] sm:$0xff]  ;;  %v1407_v14 = vpack.c.bf16 %v47_v11, %v45_v10  ;;  %v49_v16 = vld [vmem:[%s2116_s1 + $0x40] sm:$0xff]  ;;  %v51_v17 = vld [vmem:[%s2116_s1 + $0x50] sm:$0xff] }
   0x5   :  { %1404 = vmatpush1.bf16.msra.mxu0 %v1403_v8  ;;  %v1409_v15 = vpack.c.bf16 %v52_v13, %v50_v12  ;;  %v54_v18 = vld [vmem:[%s2116_s1 + $0x68] sm:$0xff]  ;;  %v56_v19 = vld [vmem:[%s2116_s1 + $0x78] sm:$0xff]  ;;  %v1411_v20 = vpack.c.bf16 %v51_v17, %v49_v16  ;;  %v53_v22 = vld [vmem:[%s2116_s1 + $0x60] sm:$0xff] }
   0x6   :  { %1406 = vmatprep.subr.bf16.mxu0 %v1405_v9  ;;  %v1413_v21 = vpack.c.bf16 %v56_v19, %v54_v18  ;;  %v55_v23 = vld [vmem:[%s2116_s1 + $0x70] sm:$0xff]  ;;  %v1702_v25 = vld [vmem:[%s2117_s0] sm:$0xff]  ;;  %v235_v39 = vld [vmem:[%s2120_s2 + $0x8] sm:$0xff] }
   0x7   :  { %v1415_v24 = vpack.c.bf16 %v55_v23, %v53_v22  ;;  %v1045_v34 = vld [vmem:[%s2118_s6] ss:$0 sm:$0xff]  ;;  %v236_v43 = vld [vmem:[%s2120_s2 + $0x10] sm:$0xff]  ;;  %v237_v44 = vld [vmem:[%s2120_s2 + $0x18] sm:$0xff] }
   0x8   :  { %v1718_v35 = vld [vmem:[%s2119_s4] sm:$0xf]  ;;  %v1421_v45 = vpack.c.bf16 %v237_v44, %v236_v43  ;;  %v239_v47 = vld [vmem:[%s2120_s2 + $0x28] sm:$0xff]  ;;  %v240_v49 = vld [vmem:[%s2120_s2 + $0x30] sm:$0xff] }
   0x9   :  { %1408 = vmatpush1.bf16.msra.mxu0 %v1407_v14  ;;  %1203 = vmatpush3.msk.msra.mxu1 %vm160_vm2, %v1718_v35  ;;  %v234_v38 = vld [vmem:[%s2120_s2] sm:$0xff]  ;;  %v241_v50 = vld [vmem:[%s2120_s2 + $0x38] sm:$0xff]  ;;  %v243_v53 = vld [vmem:[%s2120_s2 + $0x48] sm:$0xff] }
   0xa   :  { %1410 = vmatprep.subr.bf16.mxu0 %v1409_v15  ;;  %1417 = vmatprep.subr.bf16.mxu1 %v1586_v36  ;;  %v1418_v41 = vpack.c.bf16 %v235_v39, %v234_v38  ;;  %v238_v46 = vld [vmem:[%s2120_s2 + $0x20] sm:$0xff]  ;;  %v1427_v51 = vpack.c.bf16 %v241_v50, %v240_v49  ;;  %v244_v55 = vld [vmem:[%s2120_s2 + $0x50] sm:$0xff]  ;;  %v245_v56 = vld [vmem:[%s2120_s2 + $0x58] sm:$0xff] }
   0xb   :  { %v1424_v48 = vpack.c.bf16 %v239_v47, %v238_v46  ;;  %v242_v52 = vld [vmem:[%s2120_s2 + $0x40] sm:$0xff]  ;;  %v1433_v57 = vpack.c.bf16 %v245_v56, %v244_v55  ;;  %v247_v59 = vld [vmem:[%s2120_s2 + $0x68] sm:$0xff]  ;;  %v248_v61 = vld [vmem:[%s2120_s2 + $0x70] sm:$0xff] }
   0xc   :  { %v1430_v54 = vpack.c.bf16 %v243_v53, %v242_v52  ;;  %v246_v58 = vld [vmem:[%s2120_s2 + $0x60] sm:$0xff]  ;;  %v249_v62 = vld [vmem:[%s2120_s2 + $0x78] sm:$0xff]  ;;  %v323_v2 = vld [vmem:[%s2121_s3 + $0x8] sm:$0xff] }
   0xd   :  { %1412 = vmatpush1.bf16.msra.mxu0 %v1411_v20  ;;  %v1436_v60 = vpack.c.bf16 %v247_v59, %v246_v58  ;;  %v1439_v63 = vpack.c.bf16 %v249_v62, %v248_v61  ;;  %v322_v1 = vld [vmem:[%s2121_s3] sm:$0xff]  ;;  %v324_v4 = vld [vmem:[%s2121_s3 + $0x10] sm:$0xff]  ;;  %v325_v6 = vld [vmem:[%s2121_s3 + $0x18] sm:$0xff] }
   0xe   :  { %1414 = vmatprep.subr.bf16.mxu0 %v1413_v21  ;;  %v1442_v5 = vpack.c.bf16 %v323_v2, %v322_v1  ;;  %v1445_v7 = vpack.c.bf16 %v325_v6, %v324_v4  ;;  %v326_v8 = vld [vmem:[%s2121_s3 + $0x20] sm:$0xff]  ;;  %v327_v9 = vld [vmem:[%s2121_s3 + $0x28] sm:$0xff]  ;;  %v328_v11 = vld [vmem:[%s2121_s3 + $0x30] sm:$0xff] }
   0xf   :  { %v1448_v10 = vpack.c.bf16 %v327_v9, %v326_v8  ;;  %v329_v12 = vld [vmem:[%s2121_s3 + $0x38] sm:$0xff]  ;;  %v330_v14 = vld [vmem:[%s2121_s3 + $0x40] sm:$0xff]  ;;  %v331_v15 = vld [vmem:[%s2121_s3 + $0x48] sm:$0xff] }
  0x10   :  { %v1451_v13 = vpack.c.bf16 %v329_v12, %v328_v11  ;;  %v1454_v16 = vpack.c.bf16 %v331_v15, %v330_v14  ;;  %v332_v17 = vld [vmem:[%s2121_s3 + $0x50] sm:$0xff]  ;;  %v333_v18 = vld [vmem:[%s2121_s3 + $0x58] sm:$0xff]  ;;  %v334_v20 = vld [vmem:[%s2121_s3 + $0x60] sm:$0xff] }
  0x11   :  { %1416 = vmatpush1.bf16.msra.mxu0 %v1415_v24  ;;  %v1457_v19 = vpack.c.bf16 %v333_v18, %v332_v17  ;;  %v335_v21 = vld [vmem:[%s2121_s3 + $0x68] sm:$0xff]  ;;  %v336_v23 = vld [vmem:[%s2121_s3 + $0x70] sm:$0xff]  ;;  %v337_v24 = vld [vmem:[%s2121_s3 + $0x78] sm:$0xff] }
  0x12   :  { %1441 = vmatprep.subr.bf16.mxu0 %v1586_v36  ;;  %v1460_v22 = vpack.c.bf16 %v335_v21, %v334_v20  ;;  %v1053_v39 = vld [vmem:[%s2116_s1 + $0xa0] sm:$0xff]  ;;  %v1059_v52 = vld [vmem:[%s2116_s1 + $0xd0] sm:$0xff]  ;;  %v1064_v55 = vld [vmem:[%s2116_s1 + $0xf8] sm:$0xff] }
  0x13   :  { %v1063_v58 = vld [vmem:[%s2116_s1 + $0xf0] sm:$0xff]  ;;  %v1068_v14 = vld [vmem:[%s2120_s2 + $0x80] sm:$0xff]  ;;  %v1069_v15 = vld [vmem:[%s2120_s2 + $0x88] sm:$0xff] }
  0x14   :  { %1044 = vmatmul.mubr.msk.f32.vlgmr.msra.gmra.mrb[0].mxu0 %vm57_vm0, %v1702_v25  ;;  %v1482_v17 = vpack.c.bf16 %v1069_v15, %v1068_v14  ;;  %v1072_v21 = vld [vmem:[%s2120_s2 + $0xa0] sm:$0xff]  ;;  %v1098_v15 = vld [vmem:[%s2121_s3 + $0xf0] sm:$0xff] }
  0x15   :  { %1274 = vmatprep.mubr.msk.f32.mxu0 %vm1585_vm3, %v1584_v3  ;;  %1443 = vmatpush3.bf16.msra.mxu0 %v1442_v5 }
  0x16   :  { %1444 = vmatprep.subr.bf16.mxu0 %v1586_v36 }
  0x19   :  { %1446 = vmatpush3.bf16.msra.mxu0 %v1445_v7 }
  0x1a   :  { %1447 = vmatprep.subr.bf16.mxu0 %v1586_v36 }
  0x1d   :  { %1449 = vmatpush3.bf16.msra.mxu0 %v1448_v10 }
  0x1e   :  { %1450 = vmatprep.subr.bf16.mxu0 %v1586_v36 }
  0x21   :  { %1452 = vmatpush3.bf16.msra.mxu0 %v1451_v13 }
  0x22   :  { %1453 = vmatprep.subr.bf16.mxu0 %v1586_v36 }
  0x25   :  { %1455 = vmatpush3.bf16.msra.mxu0 %v1454_v16 }
  0x26   :  { %1456 = vmatprep.subr.bf16.mxu0 %v1586_v36 }
  0x29   :  { %1458 = vmatpush3.bf16.msra.mxu0 %v1457_v19  ;;  %v1071_v19 = vld [vmem:[%s2120_s2 + $0x98] sm:$0xff] }
  0x2a   :  { %1459 = vmatprep.subr.bf16.mxu0 %v1586_v36 }
  0x2d   :  { %1461 = vmatpush3.bf16.msra.mxu0 %v1460_v22  ;;  %v1073_v22 = vld [vmem:[%s2120_s2 + $0xa8] sm:$0xff] }
  0x2e   :  { %1462 = vmatprep.subr.bf16.mxu0 %v1586_v36 }
  0xe7   :  { %v127_v26 = vpop.f32.mrb[0].mxu0 }
  0xe8   :  { %v1706_v27 = vpop.f32.mrb[1].mxu0 }
  0xe9   :  { %v145_v28 = vsel %vm144_vm1, %v1706_v27, -inf }
  0xea   :  { %146 = vmax.xlane.f32.xlu0 %v145_v28  ;;  %v1050_v28 = vld [vmem:[%s2116_s1 + $0x88] sm:$0xff] }
 0x177   :  { %v147_v29 = vpop.xlane.xlu0 %146 }
 0x178   :  { %v148_v30 = vsub.f32 %v1706_v27, %v147_v29  ;;  %v1052_v29 = vld [vmem:[%s2116_s1 + $0x98] sm:$0xff] }
 0x17a   :  { %v149_v31 = vmul.f32 1.442695, %v148_v30  ;;  %v1049_v30 = vld [vmem:[%s2116_s1 + $0x80] sm:$0xff] }
 0x17c   :  { %1564 = vpow2.f32 %v149_v31  ;;  %v1465_v31 = vpack.c.bf16 %v1052_v29, %v1050_v28  ;;  %v1076_v29 = vld [vmem:[%s2120_s2 + $0xc0] sm:$0xff] }
 0x186   :  { %v1565_v32 = vpop.eup %1564 }
 0x187   :  { %v151_v33 = vsel %vm144_vm1, %v1565_v32, 0.0 }
 0x188   :  { %152 = vadd.xlane.f32.xlu0 %v151_v33  ;;  %v1054_v33 = vld [vmem:[%s2116_s1 + $0xa8] sm:$0xff] }
 0x19e   :  { %139 = vrot.lane.b32.xlu0 %v1045_v34, %s1587_s16  ;;  %v1056_v34 = vld [vmem:[%s2116_s1 + $0xb8] sm:$0xff] }
 0x19f   :  { %v1469_v38 = vpack.c.bf16 %v1056_v34, %v1054_v33  ;;  %v1079_v33 = vld [vmem:[%s2120_s2 + $0xd8] sm:$0xff] }
 0x215   :  { %v153_v37 = vpop.xlane.xlu0 %152 }
 0x216   :  { %1566 = vrcp.f32 %v153_v37 }
 0x217   :  { %1568 = vtanh.f32 %v127_v26  ;;  %v1463_v26 = vpack.c.bf16 %v337_v24, %v336_v23  ;;  %v1488_v23 = vpack.c.bf16 %v1073_v22, %v1072_v21  ;;  %v1074_v24 = vld [vmem:[%s2120_s2 + $0xb0] sm:$0xff]  ;;  %v873_v21 = vld [vmem:[%s2124_s9 + $0x40] sm:$0xff]  ;;  %v874_v22 = vld [vmem:[%s2124_s9 + $0x48] sm:$0xff] }
 0x219   :  { %1464 = vmatpush3.bf16.msra.mxu0 %v1463_v26  ;;  %v140_v11 = vpop.permute.xlu0 %139  ;;  %v1075_v26 = vld [vmem:[%s2120_s2 + $0xb8] sm:$0xff] }
 0x21a   :  { %1505 = vmatprep.subr.bf16.mxu0 %v1586_v36  ;;  %v1491_v28 = vpack.c.bf16 %v1075_v26, %v1074_v24  ;;  %v1542_v24 = vpack.c.bf16 %v874_v22, %v873_v21 }
 0x220   :  { %v1567_v40 = vpop.eup %1566 }
 0x221   :  { %v155_v42 = vmul.f32 %v1567_v40, %v1565_v32  ;;  %v1569_v0 = vpop.eup %1568  ;;  %v1051_v32 = vld [vmem:[%s2116_s1 + $0x90] sm:$0xff] }
 0x222   :  { %v1467_v37 = vpack.c.bf16 %v1051_v32, %v1049_v30  ;;  %v1055_v40 = vld [vmem:[%s2116_s1 + $0xb0] sm:$0xff]  ;;  %v1077_v30 = vld [vmem:[%s2120_s2 + $0xc8] sm:$0xff] }
 0x223   :  { %1205 = vmatmul.mubr.msk.f32.vlgmr.msra.gmra.mrb[0].mxu1 %vm144_vm1, %v155_v42  ;;  %v1060_v42 = vld [vmem:[%s2116_s1 + $0xd8] sm:$0xff]  ;;  %v1471_v43 = vpack.c.bf16 %v1055_v40, %v1053_v39  ;;  %v1078_v32 = vld [vmem:[%s2120_s2 + $0xd0] sm:$0xff] }
 0x224   :  { %1419 = vmatpush3.bf16.msra.mxu1 %v1418_v41  ;;  %1239 = vmatprep.mubr.msk.f32.mxu1 %vm1585_vm3, %v1584_v3  ;;  %v1058_v41 = vld [vmem:[%s2116_s1 + $0xc8] sm:$0xff]  ;;  %v1497_v34 = vpack.c.bf16 %v1079_v33, %v1078_v32  ;;  %v1082_v40 = vld [vmem:[%s2120_s2 + $0xf0] sm:$0xff]  ;;  %v865_v33 = vld [vmem:[%s2124_s9] sm:$0xff] }
 0x225   :  { %1420 = vmatprep.subr.bf16.mxu1 %v1586_v36  ;;  %v1473_v44 = vpack.c.bf16 %v1060_v42, %v1058_v41  ;;  %v1083_v41 = vld [vmem:[%s2120_s2 + $0xf8] sm:$0xff] }
 0x226   :  { %v1503_v42 = vpack.c.bf16 %v1083_v41, %v1082_v40  ;;  %v867_v41 = vld [vmem:[%s2124_s9 + $0x10] sm:$0xff] }
 0x228   :  { %1422 = vmatpush3.bf16.msra.mxu1 %v1421_v45 }
 0x229   :  { %1423 = vmatprep.subr.bf16.mxu1 %v1586_v36 }
 0x22c   :  { %1425 = vmatpush3.bf16.msra.mxu1 %v1424_v48 }
 0x22d   :  { %1426 = vmatprep.subr.bf16.mxu1 %v1586_v36 }
 0x230   :  { %1428 = vmatpush3.bf16.msra.mxu1 %v1427_v51  ;;  %v1057_v51 = vld [vmem:[%s2116_s1 + $0xc0] sm:$0xff] }
 0x231   :  { %1429 = vmatprep.subr.bf16.mxu1 %v1586_v36  ;;  %v1475_v53 = vpack.c.bf16 %v1059_v52, %v1057_v51  ;;  %v779_v51 = vld [vmem:[%s2123_s7 + $0x28] sm:$0xff] }
 0x234   :  { %1431 = vmatpush3.bf16.msra.mxu1 %v1430_v54  ;;  %v1062_v54 = vld [vmem:[%s2116_s1 + $0xe8] sm:$0xff] }
 0x235   :  { %1432 = vmatprep.subr.bf16.mxu1 %v1586_v36  ;;  %v1477_v56 = vpack.c.bf16 %v1064_v55, %v1062_v54  ;;  %v781_v54 = vld [vmem:[%s2123_s7 + $0x38] sm:$0xff] }
 0x238   :  { %1434 = vmatpush3.bf16.msra.mxu1 %v1433_v57  ;;  %v1061_v57 = vld [vmem:[%s2116_s1 + $0xe0] sm:$0xff]  ;;  %s1588_s1 = smov 124  }
 0x239   :  { %1435 = vmatprep.subr.bf16.mxu1 %v1586_v36  ;;  %v1479_v59 = vpack.c.bf16 %v1063_v58, %v1061_v57  ;;  %v1084_v57 = vld [vmem:[%s2121_s3 + $0x80] sm:$0xff]  ;;  %v1085_v58 = vld [vmem:[%s2121_s3 + $0x88] sm:$0xff] }
 0x23c   :  { %1437 = vmatpush3.bf16.msra.mxu1 %v1436_v60  ;;  %v1048_v60 = vld [vmem:[%s2122_s5] ss:$0 sm:$0xff] }
 0x23d   :  { %1438 = vmatprep.subr.bf16.mxu1 %v1586_v36 }
 0x240   :  { %1440 = vmatpush3.bf16.msra.mxu1 %v1439_v63 }
 0x241   :  { %1466 = vmatprep.subr.bf16.mxu1 %v1465_v31  ;;  %v1494_v31 = vpack.c.bf16 %v1077_v30, %v1076_v29  ;;  %v876_v29 = vld [vmem:[%s2124_s9 + $0x58] sm:$0xff]  ;;  %v1101_v30 = vld [vmem:[%s2125_s8] ss:$0 sm:$0xff] }
 0x243   :  { %1240 = vmatmul.mubr.f32.vlgmr.msra.gmra.mrb[2].mxu1 %v1569_v0 }
 0x244   :  { %499 = vmatprep.mubr.f32.mxu1 %v1584_v3  ;;  %1468 = vmatpush1.bf16.msra.mxu1 %v1467_v37  ;;  %v1080_v37 = vld [vmem:[%s2120_s2 + $0xe0] sm:$0xff] }
 0x245   :  { %1470 = vmatprep.subr.bf16.mxu1 %v1469_v38  ;;  %v1081_v38 = vld [vmem:[%s2120_s2 + $0xe8] sm:$0xff] }
 0x246   :  { %v1500_v39 = vpack.c.bf16 %v1081_v38, %v1080_v37 }
 0x248   :  { %1472 = vmatpush1.bf16.msra.mxu1 %v1471_v43  ;;  %v774_v43 = vld [vmem:[%s2123_s7] sm:$0xff] }
 0x249   :  { %1474 = vmatprep.subr.bf16.mxu1 %v1473_v44  ;;  %v775_v44 = vld [vmem:[%s2123_s7 + $0x8] sm:$0xff] }
 0x24c   :  { %1476 = vmatpush1.bf16.msra.mxu1 %v1475_v53  ;;  %v780_v53 = vld [vmem:[%s2123_s7 + $0x30] sm:$0xff] }
 0x24d   :  { %1478 = vmatprep.subr.bf16.mxu1 %v1477_v56  ;;  %v1539_v55 = vpack.c.bf16 %v781_v54, %v780_v53 }
 0x250   :  { %1480 = vmatpush1.bf16.msra.mxu1 %v1479_v59  ;;  %v1086_v59 = vld [vmem:[%s2121_s3 + $0x90] sm:$0xff] }
 0x251   :  { %1277 = vmatprep.subr.mxu1 %v1584_v3 }
 0x2f6   :  { %v230_v45 = vpop.f32.mrb[0].mxu1 }
 0x2f7   :  { %v1206_v46 = vpop.f32.mrb[1].mxu1 }
 0x2f8   :  { %v776_v46 = vld [vmem:[%s2123_s7 + $0x10] sm:$0xff] }
 0x316   :  { %v316_v47 = vpop.f32.mrb[2].mxu1 }
 0x317   :  { %1570 = vtanh.f32 %v316_v47  ;;  %v1241_v48 = vpop.f32.mrb[3].mxu1  ;;  %v777_v47 = vld [vmem:[%s2123_s7 + $0x18] sm:$0xff] }
 0x321   :  { %v1571_v49 = vpop.eup %1570 }
 0x322   :  { %v321_v50 = vmul.f32 %v1571_v49, %v230_v45  ;;  %v1530_v45 = vpack.c.bf16 %v775_v44, %v774_v43  ;;  %v1533_v49 = vpack.c.bf16 %v777_v47, %v776_v46  ;;  %v869_v44 = vld [vmem:[%s2124_s9 + $0x20] sm:$0xff]  ;;  %v872_v47 = vld [vmem:[%s2124_s9 + $0x38] sm:$0xff] }
 0x324   :  { %1275 = vmatmul.mubr.f32.vlgmr.msra.gmra.mrb[2].mxu0 %v321_v50  ;;  %v778_v50 = vld [vmem:[%s2123_s7 + $0x20] sm:$0xff] }
 0x325   :  { %1349 = vmatprep.mubr.msk.f32.mxu0 %vm1585_vm3, %v1584_v3  ;;  %v1536_v52 = vpack.c.bf16 %v779_v51, %v778_v50  ;;  %v1100_v50 = vld [vmem:[%s2122_s5 + $0x1] ss:$0 sm:$0xff] }
 0x3f7   :  { %v409_v61 = vpop.f32.mrb[2].mxu0 }
 0x3f8   :  { %v410_v62 = vadd.f32 %v1048_v60, %v409_v61  ;;  %v1276_v63 = vpop.f32.mrb[3].mxu0  ;;  %v1506_v60 = vpack.c.bf16 %v1085_v58, %v1084_v57  ;;  %v1087_v61 = vld [vmem:[%s2121_s3 + $0x98] sm:$0xff] }
 0x3f9   :  { %v1088_v63 = vld [vmem:[%s2121_s3 + $0xa0] sm:$0xff] }
 0x3fa   :  { %v413_v0 = vmul.f32 %v410_v62, %v1702_v25  ;;  %1507 = vmatpush3.bf16.msra.mxu0 %v1506_v60  ;;  %v1509_v62 = vpack.c.bf16 %v1087_v61, %v1086_v59 }
 0x3fb   :  { %1508 = vmatprep.subr.bf16.mxu0 %v1586_v36 }
 0x3fc   :  { %v1899_v1 = vadd.f32 %v413_v0, %v1702_v25  ;;  %v1089_v0 = vld [vmem:[%s2121_s3 + $0xa8] sm:$0xff] }
 0x3fe   :  { %1065 = vmatmul.mubr.msk.f32.vlgmr.msra.gmra.mrb[4].mxu1 %vm57_vm0, %v1899_v1  ;;  %1510 = vmatpush3.bf16.msra.mxu0 %v1509_v62 }
 0x3ff   :  { %1278 = vmatpush3.msk.msra.mxu1 %vm160_vm2, %v1718_v35  ;;  %1279 = vmatprep.mubr.msk.f32.mxu1 %vm1585_vm3, %v1584_v3  ;;  %v142_v35 = vadd.f32 %v140_v11, %v1706_v27  ;;  %v1070_v27 = vld [vmem:[%s2120_s2 + $0x90] sm:$0xff]  ;;  %v1095_v11 = vld [vmem:[%s2121_s3 + $0xd8] sm:$0xff] }
 0x400   :  { %1481 = vmatprep.subr.bf16.mxu1 %v1586_v36  ;;  %v1485_v20 = vpack.c.bf16 %v1071_v19, %v1070_v27  ;;  %1511 = vmatprep.subr.bf16.mxu0 %v1586_v36 }
 0x401   :  { %v143_v12 = vmax.f32 %v142_v35, 0.0 }
 0x4d1   :  { %v501_v2 = vpop.f32.mrb[4].mxu1 }
 0x4d2   :  { %v503_v4 = vpop.f32.mrb[5].mxu1 }
 0x4d3   :  { %v507_v5 = vsel %vm144_vm1, %v503_v4, -inf }
 0x4d4   :  { %508 = vmax.xlane.f32.xlu1 %v507_v5  ;;  %v1091_v5 = vld [vmem:[%s2121_s3 + $0xb8] sm:$0xff] }
 0x561   :  { %v509_v6 = vpop.xlane.xlu1 %508 }
 0x562   :  { %v510_v7 = vsub.f32 %v503_v4, %v509_v6  ;;  %v1090_v4 = vld [vmem:[%s2121_s3 + $0xb0] sm:$0xff] }
 0x563   :  { %v1515_v6 = vpack.c.bf16 %v1091_v5, %v1090_v4 }
 0x564   :  { %v511_v8 = vmul.f32 1.442695, %v510_v7  ;;  %v1092_v7 = vld [vmem:[%s2121_s3 + $0xc0] sm:$0xff] }
 0x566   :  { %1572 = vpow2.f32 %v511_v8  ;;  %v1093_v8 = vld [vmem:[%s2121_s3 + $0xc8] sm:$0xff] }
 0x570   :  { %v1573_v9 = vpop.eup %1572 }
 0x571   :  { %v513_v10 = vsel %vm144_vm1, %v1573_v9, 0.0 }
 0x572   :  { %514 = vadd.xlane.f32.xlu1 %v513_v10  ;;  %v1094_v10 = vld [vmem:[%s2121_s3 + $0xd0] sm:$0xff] }
 0x573   :  { %v1521_v35 = vpack.c.bf16 %v1095_v11, %v1094_v10 }
 0x583   :  { %790 = vrot.lane.b32.xlu1 %v143_v12, %s1588_s1  ;;  %v1096_v12 = vld [vmem:[%s2121_s3 + $0xe0] sm:$0xff] }
 0x5ff   :  { %v515_v13 = vpop.xlane.xlu1 %514 }
 0x600   :  { %1574 = vrcp.f32 %v515_v13  ;;  %v1097_v13 = vld [vmem:[%s2121_s3 + $0xe8] sm:$0xff] }
 0x601   :  { %1576 = vtanh.f32 %v501_v2  ;;  %v1512_v2 = vpack.c.bf16 %v1089_v0, %v1088_v63  ;;  %v1524_v14 = vpack.c.bf16 %v1097_v13, %v1096_v12 }
 0x603   :  { %v791_v56 = vpop.permute.xlu1 %790  ;;  %1513 = vmatpush3.bf16.msra.mxu0 %v1512_v2 }
 0x604   :  { %1514 = vmatprep.subr.bf16.mxu0 %v1586_v36 }
 0x607   :  { %1516 = vmatpush3.bf16.msra.mxu0 %v1515_v6 }
 0x608   :  { %1517 = vmatprep.subr.bf16.mxu0 %v1586_v36 }
 0x60a   :  { %v1575_v16 = vpop.eup %1574 }
 0x60b   :  { %v517_v18 = vmul.f32 %v1575_v16, %v1573_v9  ;;  %v1577_v48 = vpop.eup %1576  ;;  %v1518_v9 = vpack.c.bf16 %v1093_v8, %v1092_v7  ;;  %v1099_v16 = vld [vmem:[%s2121_s3 + $0xf8] sm:$0xff] }
 0x60d   :  { %1280 = vmatmul.mubr.msk.f32.vlgmr.msra.gmra.mrb[6].mxu1 %vm144_vm1, %v517_v18  ;;  %1519 = vmatpush3.bf16.msra.mxu0 %v1518_v9 }
 0x60e   :  { %1483 = vmatpush3.bf16.msra.mxu1 %v1482_v17  ;;  %1314 = vmatprep.mubr.msk.f32.mxu1 %vm1585_vm3, %v1584_v3  ;;  %v1527_v17 = vpack.c.bf16 %v1099_v16, %v1098_v15 }
 0x60f   :  { %1484 = vmatprep.subr.bf16.mxu1 %v1586_v36  ;;  %1520 = vmatprep.subr.bf16.mxu0 %v1586_v36 }
 0x611   :  { %1522 = vmatpush3.bf16.msra.mxu0 %v1521_v35 }
 0x612   :  { %1486 = vmatpush3.bf16.msra.mxu1 %v1485_v20  ;;  %1523 = vmatprep.subr.bf16.mxu0 %v1586_v36 }
 0x613   :  { %1487 = vmatprep.subr.bf16.mxu1 %v1586_v36 }
 0x615   :  { %1525 = vmatpush3.bf16.msra.mxu0 %v1524_v14 }
 0x616   :  { %1489 = vmatpush3.bf16.msra.mxu1 %v1488_v23  ;;  %1526 = vmatprep.subr.bf16.mxu0 %v1586_v36 }
 0x617   :  { %1490 = vmatprep.subr.bf16.mxu1 %v1586_v36 }
 0x619   :  { %1528 = vmatpush3.bf16.msra.mxu0 %v1527_v17 }
 0x61a   :  { %1492 = vmatpush3.bf16.msra.mxu1 %v1491_v28  ;;  %1541 = vmatprep.subr.bf16.mxu0 %v1586_v36  ;;  %v875_v28 = vld [vmem:[%s2124_s9 + $0x50] sm:$0xff] }
 0x61b   :  { %1493 = vmatprep.subr.bf16.mxu1 %v1586_v36 }
 0x61e   :  { %1495 = vmatpush3.bf16.msra.mxu1 %v1494_v31  ;;  %v1545_v31 = vpack.c.bf16 %v876_v29, %v875_v28 }
 0x61f   :  { %1496 = vmatprep.subr.bf16.mxu1 %v1586_v36 }
 0x622   :  { %1498 = vmatpush3.bf16.msra.mxu1 %v1497_v34  ;;  %v866_v34 = vld [vmem:[%s2124_s9 + $0x8] sm:$0xff] }
 0x623   :  { %1499 = vmatprep.subr.bf16.mxu1 %v1586_v36  ;;  %v1548_v40 = vpack.c.bf16 %v866_v34, %v865_v33 }
 0x626   :  { %1501 = vmatpush3.bf16.msra.mxu1 %v1500_v39 }
 0x627   :  { %1502 = vmatprep.subr.bf16.mxu1 %v1586_v36 }
 0x62a   :  { %1504 = vmatpush3.bf16.msra.mxu1 %v1503_v42  ;;  %v868_v42 = vld [vmem:[%s2124_s9 + $0x18] sm:$0xff] }
 0x62b   :  { %1529 = vmatprep.subr.bf16.mxu1 %v1586_v36  ;;  %v1551_v43 = vpack.c.bf16 %v868_v42, %v867_v41 }
 0x62d   :  { %1315 = vmatmul.mubr.f32.vlgmr.msra.gmra.mrb[8].mxu1 %v1577_v48 }
 0x62e   :  { %1531 = vmatpush3.bf16.msra.mxu1 %v1530_v45  ;;  %1368 = vmatprep.mubr.msk.f32.mxu1 %vm1585_vm3, %v1584_v3  ;;  %v870_v45 = vld [vmem:[%s2124_s9 + $0x28] sm:$0xff] }
 0x62f   :  { %1532 = vmatprep.subr.bf16.mxu1 %v1586_v36  ;;  %v1554_v46 = vpack.c.bf16 %v870_v45, %v869_v44 }
 0x632   :  { %1534 = vmatpush3.bf16.msra.mxu1 %v1533_v49  ;;  %v16_v49 = vstv %s2126_s10 }
 0x633   :  { %1535 = vmatprep.subr.bf16.mxu1 %v1586_v36  ;;  %17 = vst [vmem:[#allocation2] sm:$0x1] %v16_v49 }
 0x636   :  { %1537 = vmatpush3.bf16.msra.mxu1 %v1536_v52 }
 0x637   :  { %1538 = vmatprep.subr.bf16.mxu1 %v1586_v36 }
 0x63a   :  { %1540 = vmatpush3.bf16.msra.mxu1 %v1539_v55  ;;  %v1105_v58 = vld [vmem:[#allocation2] ss:$0 sm:$0xff] }
 0x63d   :  { %1369 = vmatmul.mubr.msk.f32.vlgmr.msra.gmra.mrb[10].mxu1 %vm57_vm0, %v791_v56 }
 0x6e0   :  { %v587_v18 = vpop.f32.mrb[6].mxu1 }
 0x6e1   :  { %v1281_v27 = vpop.f32.mrb[7].mxu1 }
 0x700   :  { %v674_v19 = vpop.f32.mrb[8].mxu1 }
 0x701   :  { %1578 = vtanh.f32 %v674_v19  ;;  %v1316_v20 = vpop.f32.mrb[9].mxu1 }
 0x70b   :  { %v1579_v23 = vpop.eup %1578 }
 0x70c   :  { %v679_v26 = vmul.f32 %v1579_v23, %v587_v18 }
 0x70e   :  { %1350 = vmatmul.mubr.f32.vlgmr.msra.gmra.mrb[4].mxu0 %v679_v26 }
 0x70f   :  { %1543 = vmatpush3.bf16.msra.mxu0 %v1542_v24  ;;  %1379 = vmatprep.mubr.msk.f32.mxu0 %vm1585_vm3, %v1584_v3 }
 0x710   :  { %v860_v32 = vpop.f32.mrb[10].mxu1  ;;  %1544 = vmatprep.subr.bf16.mxu0 %v1586_v36 }
 0x711   :  { %v861_v37 = vadd.f32 %v1101_v30, %v860_v32  ;;  %v1370_v38 = vpop.f32.mrb[11].mxu1 }
 0x713   :  { %v864_v39 = vmax.f32 %v861_v37, 0.0  ;;  %1546 = vmatpush3.bf16.msra.mxu0 %v1545_v31 }
 0x714   :  { %1547 = vmatprep.subr.bf16.mxu0 %v1586_v36 }
 0x716   :  { %1380 = vmatmul.mubr.msk.f32.vlgmr.msra.gmra.mrb[6].mxu0 %vm877_vm4, %v864_v39 }
 0x717   :  { %1549 = vmatpush3.bf16.msra.mxu0 %v1548_v40  ;;  %1398 = vmatprep.mubr.msk.f32.mxu0 %vm1585_vm3, %v1584_v3  ;;  %v871_v3 = vld [vmem:[%s2124_s9 + $0x30] sm:$0xff] }
 0x718   :  { %1550 = vmatprep.subr.bf16.mxu0 %v1586_v36  ;;  %v1557_v48 = vpack.c.bf16 %v872_v47, %v871_v3 }
 0x71b   :  { %1552 = vmatpush3.bf16.msra.mxu0 %v1551_v43 }
 0x71c   :  { %1553 = vmatprep.subr.bf16.mxu0 %v1586_v36 }
 0x71f   :  { %1555 = vmatpush3.bf16.msra.mxu0 %v1554_v46 }
 0x720   :  { %1556 = vmatprep.subr.bf16.mxu0 %v1586_v36 }
 0x723   :  { %1558 = vmatpush3.bf16.msra.mxu0 %v1557_v48 }
 0x7e1   :  { %v768_v36 = vpop.f32.mrb[4].mxu0 }
 0x7e2   :  { %v769_v51 = vadd.f32 %v1100_v50, %v768_v36  ;;  %v1351_v52 = vpop.f32.mrb[5].mxu0 }
 0x7e4   :  { %v772_v53 = vmul.f32 %v769_v51, %v1702_v25 }
 0x7e6   :  { %v773_v54 = vadd.f32 %v772_v53, %v1899_v1 }
 0x7e8   :  { %1399 = vmatmul.mubr.msk.f32.vlgmr.msra.gmra.mrb[8].mxu0 %vm57_vm0, %v773_v54 }
 0x7e9   :  { %v947_v55 = vpop.f32.mrb[6].mxu0 }
 0x7ea   :  { %v1381_v56 = vpop.f32.mrb[7].mxu0 }
 0x8bb   :  { %v1020_v57 = vpop.f32.mrb[8].mxu0 }
 0x8bc   :  { %v1021_v59 = vadd.f32 %v1020_v57, %v947_v55  ;;  %v1400_v60 = vpop.f32.mrb[9].mxu0 }
 0x8be   :  { %v1031_v61 = vadd.f32 %v1105_v58, %v1021_v59 }
 0x8c0   :  { %v1106_v62 = vmul.f32 -1.442695, %v1031_v61 }
 0x8c2   :  { %1580 = vpow2.f32 %v1106_v62 }
 0x8cc   :  { %v1581_v63 = vpop.eup %1580 }
 0x8cd   :  { %v1035_v0 = vadd.f32 1.0, %v1581_v63 }
 0x8cf   :  { %1582 = vrcp.f32 %v1035_v0 }
 0x8d9   :  { %v1583_v2 = vpop.eup %1582 }
 0x8da   :  { %1039 = vst.msk [vmem:[%s2127_s11] sm:$0xff] %vm1038_vm5, %v1583_v2 }

</bundles_post_ra>
